<compile_context>
chip_gen: v7x
topology: tpu7x:2x2x1
jax: 0.10.0
libtpu: 0.0.40
codegen_flags: <defaults>
</compile_context>

<pallas_src>
import functools

import jax
import jax.numpy as jnp
from jax.experimental import pallas as pl
from jax.experimental.pallas import tpu as pltpu


def _gather_kernel(idx_ref, x_ref, o_ref, *, block_b, remain_t, row_unroll):
    """Per-batch row gather for one batch block.

    idx_ref: SMEM (B, remain_t) int32      scalar-prefetched kept forward indexes
    x_ref:   VMEM (T, block_b, C)          input slab for this batch block
    o_ref:   VMEM (remain_t, block_b, C)   gathered (kept) rows for this block
    """
    b0 = pl.program_id(0) * block_b
    C = x_ref.shape[-1]

    # Static sublane groups of the batch block (last group may be partial only
    # when block_b == B and B % 8 != 0).
    groups = [(g0, min(8, block_b - g0)) for g0 in range(0, block_b, 8)]

    # Hoist the sublane-iota masks out of the row loop (JAX does not CSE
    # broadcast_in_dim; re-creating them per iteration would re-emit them).
    sub_iota = {}
    for _, gsz in groups:
        if gsz not in sub_iota:
            sub_iota[gsz] = jax.lax.broadcasted_iota(jnp.int32, (gsz, C), 0)

    def row_body(r, carry):
        for g0, gsz in groups:
            sub = sub_iota[gsz]
            acc = None
            for s in range(gsz):
                src = idx_ref[b0 + g0 + s, r]          # scalar read from SMEM
                if gsz == block_b:
                    tile = x_ref[src]                  # (block_b, C) full-tile load
                else:
                    tile = x_ref[src, g0:g0 + gsz, :]  # (gsz, C) tile load
                if acc is None:
                    acc = tile                         # sublane 0 is the wanted row
                else:
                    # Wanted row of batch (g0+s) already sits at sublane s:
                    # merge it in with a VPU select, no sublane shift needed.
                    acc = jnp.where(sub == s, tile, acc)
            if gsz == block_b:
                o_ref[r] = acc                         # one unmasked full-tile store
            else:
                o_ref[r, g0:g0 + gsz, :] = acc
        return carry

    jax.lax.fori_loop(0, remain_t, row_body, 0, unroll=row_unroll)


def _device_kind():
    try:
        return jax.devices()[0].device_kind.lower()
    except Exception:  # pragma: no cover - defensive; fall back to conservative sizing
        return ""


def _sublane_min(dtype):
    # Minimum sublane tile multiple per element width (f32: 8, bf16: 16, int8/fp8: 32).
    return {4: 8, 2: 16, 1: 32}.get(jnp.dtype(dtype).itemsize, 8)


def _pick_block_b(B, T, C, remain_t, dtype, *, vmem_budget, prefer_two_steps):
    """Largest legal batch block whose double-buffered blocks fit the budget."""
    itemsize = jnp.dtype(dtype).itemsize

    def vmem_bytes(bb):
        # double-buffered input block + double-buffered output block
        return 2 * bb * T * C * itemsize + 2 * bb * remain_t * C * itemsize

    smin = _sublane_min(dtype)
    # Legal sublane blocks: multiples of smin that divide B, plus B itself
    # (a full-extent block dim is always layout-legal).
    cands = [bb for bb in range(smin, B + 1, smin) if B % bb == 0]
    if B not in cands:
        cands.append(B)
    cands = sorted(set(cands))

    if prefer_two_steps and B >= 2 * smin:
        # v7x: keep >= 2 grid steps so the parallel axis can shard across both
        # TensorCores.
        halved = [bb for bb in cands if bb <= B // 2]
        if halved:
            cands = halved

    fits = [bb for bb in cands if vmem_bytes(bb) <= vmem_budget]
    if fits:
        return max(fits)
    # Nothing fits: use the smallest legal block; if even that exceeds the
    # scoped VMEM limit the compiler reports it explicitly (no silent OOM).
    return min(cands)


def _pick_row_unroll(remain_t, block_b, C):
    """Cap the kept-row loop unroll so live vregs stay bounded (perf opt 2)."""
    tiles_per_row = max(1, block_b // 8) * max(1, C // 128)
    if remain_t * tiles_per_row <= 8:
        return True          # fully unroll tiny loops (LLO scheduler visibility)
    return 1                 # one row at a time; bb interleave inside is already 8


def _pad_c(x):
    C = x.shape[-1]
    Cp = ((C + 127) // 128) * 128
    if Cp == C:
        return x, C
    pad = [(0, 0)] * (x.ndim - 1) + [(0, Cp - C)]
    return jnp.pad(x, pad), C


def patch_shuffle_gather(patches, idx_kept_bt, remain_t, *, block_b=None):
    """patches: (T, B, C); idx_kept_bt: (B, remain_t) int32 kept forward indexes.

    Returns the gathered kept rows, shape (remain_t, B, C).
    """
    T, B, C = patches.shape
    assert idx_kept_bt.shape == (B, remain_t)

    # Lane-dense layout: pad C to a multiple of 128 (no-op for typical widths).
    patches_p, c_orig = _pad_c(patches)
    Cp = patches_p.shape[-1]

    kind = _device_kind()
    is_v7 = "v7" in kind
    if is_v7:
        vmem_budget, vmem_limit = 24 << 20, None          # 64 MiB physical VMEM
    elif ("v5" in kind) or ("v6" in kind):
        vmem_budget, vmem_limit = 56 << 20, 64 << 20      # 128 MiB physical VMEM
    else:
        vmem_budget, vmem_limit = 24 << 20, None          # conservative default

    if block_b is None:
        block_b = _pick_block_b(
            B, T, Cp, remain_t, patches.dtype,
            vmem_budget=vmem_budget, prefer_two_steps=is_v7,
        )
    assert B % block_b == 0, "batch block must divide B"
    row_unroll = _pick_row_unroll(remain_t, block_b, Cp)

    kernel = functools.partial(
        _gather_kernel, block_b=block_b, remain_t=remain_t, row_unroll=row_unroll
    )
    grid_spec = pltpu.PrefetchScalarGridSpec(
        num_scalar_prefetch=1,
        grid=(B // block_b,),
        in_specs=[
            pl.BlockSpec((T, block_b, Cp), lambda b, idx: (0, b, 0)),
        ],
        out_specs=pl.BlockSpec((remain_t, block_b, Cp), lambda b, idx: (0, b, 0)),
    )
    cp_kwargs = dict(dimension_semantics=("parallel",))   # batches are independent
    if vmem_limit is not None:
        cp_kwargs["vmem_limit_bytes"] = int(vmem_limit)

    out = pl.pallas_call(
        kernel,
        out_shape=jax.ShapeDtypeStruct((remain_t, B, Cp), patches.dtype),
        grid_spec=grid_spec,
        compiler_params=pltpu.CompilerParams(**cp_kwargs),
    )(idx_kept_bt.astype(jnp.int32), patches_p)

    if Cp != c_orig:
        out = out[..., :c_orig]
    return out


def patch_shuffle(patches, ratio, key):
    """JAX equivalent of PatchShuffle.forward.

    patches: (T, B, C), any float dtype.
    Returns (shuffled_patches[:remain_T], forward_indexes, backward_indexes).
    Indices are int32 (PyTorch uses int64; values are identical).
    """
    T, B, C = patches.shape
    # Same rounding expression as the PyTorch module: int(T * (1 - ratio)).
    remain_T = int(T * (1 - ratio))

    # Per-batch random permutations (glue, not the hot path), batched via vmap.
    keys = jax.random.split(key, B)
    fwd_bt = jax.vmap(lambda k: jax.random.permutation(k, T))(keys).astype(
        jnp.int32
    )  # (B, T) — batch-major layout for cheap SMEM prefetch in the kernel
    forward_indexes = fwd_bt.T  # (T, B), matches the PyTorch return layout
    backward_indexes = jnp.argsort(forward_indexes, axis=0).astype(jnp.int32)

    if remain_T == 0:
        out = jnp.zeros((0, B, C), patches.dtype)
    else:
        # Only the kept indices are prefetched (halves the SMEM footprint).
        out = patch_shuffle_gather(patches, fwd_bt[:, :remain_T], remain_T)
    return out, forward_indexes, backward_indexes


if __name__ == "__main__":
    # Small shapes consistent with (T, B, C) patch sequences; C=128 keeps every
    # row lane-dense and B=8 keeps the batch block sublane-dense.
    T, B, C = 16, 8, 128
    ratio = 0.75  # remain_T = 4

    root = jax.random.PRNGKey(0)
    k_data, k_perm = jax.random.split(root)
    patches = jax.random.normal(k_data, (T, B, C), dtype=jnp.float32)

    out, fwd, bwd = patch_shuffle(patches, ratio, k_perm)
    out = jax.block_until_ready(out)

    # Pure-JAX reference for the gather.
    remain_T = int(T * (1 - ratio))
    idx_full = jnp.broadcast_to(fwd[:, :, None], (T, B, C))
    ref = jnp.take_along_axis(patches, idx_full, axis=0)[:remain_T]

    assert out.shape == (remain_T, B, C)
    assert fwd.shape == (T, B) and bwd.shape == (T, B)
    # backward is the inverse permutation of forward (per batch).
    assert bool(
        jnp.all(jnp.take_along_axis(fwd, bwd, axis=0) == jnp.arange(T)[:, None])
    )
    assert bool(jnp.allclose(out, ref))

    print("KERNEL_OK")
</pallas_src>

<mosaic_0001>
module attributes {stable_mosaic.version = 11 : i64} {
  func.func @_gather_kernel(%arg0: i32, %arg1: memref<8x4xi32, #tpu.memory_space<smem>>, %arg2: memref<16x8x128xf32, #tpu.memory_space<vmem>>, %arg3: memref<4x8x128xf32, #tpu.memory_space<vmem>>) attributes {dimension_semantics = [#tpu.dimension_semantics<parallel>], iteration_bounds = array<i64: 1>, scalar_prefetch = 1 : i64, scratch_operands = 0 : i64, tpu.core_type = #tpu.core_type<tc>, window_params = [{transform_indices = @transform_0, window_bounds = array<i64: 16, 8, 128>}, {transform_indices = @transform_1, window_bounds = array<i64: 4, 8, 128>}]} {
    %c8_i32 = arith.constant 8 : i32
    %0 = arith.muli %arg0, %c8_i32 : i32
    %1 = tpu.iota {dimensions = array<i32: 0>} : vector<8x128xi32>
    %c0_i32 = arith.constant 0 : i32
    %c0_i32_0 = arith.constant 0 : i32
    %2 = arith.addi %0, %c0_i32_0 : i32
    %c0_i32_1 = arith.constant 0 : i32
    %3 = arith.addi %2, %c0_i32_1 : i32
    %4 = arith.index_cast %3 : i32 to index
    %5 = arith.index_cast %c0_i32 : i32 to index
    %6 = memref.load %arg1[%4, %5] : memref<8x4xi32, #tpu.memory_space<smem>>
    %7 = arith.index_cast %6 : i32 to index
    %c0 = arith.constant 0 : index
    %c0_2 = arith.constant 0 : index
    %8 = vector.load %arg2[%7, %c0, %c0_2] : memref<16x8x128xf32, #tpu.memory_space<vmem>>, vector<1x8x128xf32>
    %9 = vector.shape_cast %8 : vector<1x8x128xf32> to vector<8x128xf32>
    %c0_i32_3 = arith.constant 0 : i32
    %10 = arith.addi %0, %c0_i32_3 : i32
    %c1_i32 = arith.constant 1 : i32
    %11 = arith.addi %10, %c1_i32 : i32
    %12 = arith.index_cast %11 : i32 to index
    %13 = arith.index_cast %c0_i32 : i32 to index
    %14 = memref.load %arg1[%12, %13] : memref<8x4xi32, #tpu.memory_space<smem>>
    %15 = arith.index_cast %14 : i32 to index
    %c0_4 = arith.constant 0 : index
    %c0_5 = arith.constant 0 : index
    %16 = vector.load %arg2[%15, %c0_4, %c0_5] : memref<16x8x128xf32, #tpu.memory_space<vmem>>, vector<1x8x128xf32>
    %17 = vector.shape_cast %16 : vector<1x8x128xf32> to vector<8x128xf32>
    %c1_i32_6 = arith.constant 1 : i32
    %18 = vector.broadcast %c1_i32_6 : i32 to vector<8x128xi32>
    %19 = arith.cmpi eq, %1, %18 : vector<8x128xi32>
    %20 = arith.select %19, %17, %9 : vector<8x128xi1>, vector<8x128xf32>
    %c0_i32_7 = arith.constant 0 : i32
    %21 = arith.addi %0, %c0_i32_7 : i32
    %c2_i32 = arith.constant 2 : i32
    %22 = arith.addi %21, %c2_i32 : i32
    %23 = arith.index_cast %22 : i32 to index
    %24 = arith.index_cast %c0_i32 : i32 to index
    %25 = memref.load %arg1[%23, %24] : memref<8x4xi32, #tpu.memory_space<smem>>
    %26 = arith.index_cast %25 : i32 to index
    %c0_8 = arith.constant 0 : index
    %c0_9 = arith.constant 0 : index
    %27 = vector.load %arg2[%26, %c0_8, %c0_9] : memref<16x8x128xf32, #tpu.memory_space<vmem>>, vector<1x8x128xf32>
    %28 = vector.shape_cast %27 : vector<1x8x128xf32> to vector<8x128xf32>
    %c2_i32_10 = arith.constant 2 : i32
    %29 = vector.broadcast %c2_i32_10 : i32 to vector<8x128xi32>
    %30 = arith.cmpi eq, %1, %29 : vector<8x128xi32>
    %31 = arith.select %30, %28, %20 : vector<8x128xi1>, vector<8x128xf32>
    %c0_i32_11 = arith.constant 0 : i32
    %32 = arith.addi %0, %c0_i32_11 : i32
    %c3_i32 = arith.constant 3 : i32
    %33 = arith.addi %32, %c3_i32 : i32
    %34 = arith.index_cast %33 : i32 to index
    %35 = arith.index_cast %c0_i32 : i32 to index
    %36 = memref.load %arg1[%34, %35] : memref<8x4xi32, #tpu.memory_space<smem>>
    %37 = arith.index_cast %36 : i32 to index
    %c0_12 = arith.constant 0 : index
    %c0_13 = arith.constant 0 : index
    %38 = vector.load %arg2[%37, %c0_12, %c0_13] : memref<16x8x128xf32, #tpu.memory_space<vmem>>, vector<1x8x128xf32>
    %39 = vector.shape_cast %38 : vector<1x8x128xf32> to vector<8x128xf32>
    %c3_i32_14 = arith.constant 3 : i32
    %40 = vector.broadcast %c3_i32_14 : i32 to vector<8x128xi32>
    %41 = arith.cmpi eq, %1, %40 : vector<8x128xi32>
    %42 = arith.select %41, %39, %31 : vector<8x128xi1>, vector<8x128xf32>
    %c0_i32_15 = arith.constant 0 : i32
    %43 = arith.addi %0, %c0_i32_15 : i32
    %c4_i32 = arith.constant 4 : i32
    %44 = arith.addi %43, %c4_i32 : i32
    %45 = arith.index_cast %44 : i32 to index
    %46 = arith.index_cast %c0_i32 : i32 to index
    %47 = memref.load %arg1[%45, %46] : memref<8x4xi32, #tpu.memory_space<smem>>
    %48 = arith.index_cast %47 : i32 to index
    %c0_16 = arith.constant 0 : index
    %c0_17 = arith.constant 0 : index
    %49 = vector.load %arg2[%48, %c0_16, %c0_17] : memref<16x8x128xf32, #tpu.memory_space<vmem>>, vector<1x8x128xf32>
    %50 = vector.shape_cast %49 : vector<1x8x128xf32> to vector<8x128xf32>
    %c4_i32_18 = arith.constant 4 : i32
    %51 = vector.broadcast %c4_i32_18 : i32 to vector<8x128xi32>
    %52 = arith.cmpi eq, %1, %51 : vector<8x128xi32>
    %53 = arith.select %52, %50, %42 : vector<8x128xi1>, vector<8x128xf32>
    %c0_i32_19 = arith.constant 0 : i32
    %54 = arith.addi %0, %c0_i32_19 : i32
    %c5_i32 = arith.constant 5 : i32
    %55 = arith.addi %54, %c5_i32 : i32
    %56 = arith.index_cast %55 : i32 to index
    %57 = arith.index_cast %c0_i32 : i32 to index
    %58 = memref.load %arg1[%56, %57] : memref<8x4xi32, #tpu.memory_space<smem>>
    %59 = arith.index_cast %58 : i32 to index
    %c0_20 = arith.constant 0 : index
    %c0_21 = arith.constant 0 : index
    %60 = vector.load %arg2[%59, %c0_20, %c0_21] : memref<16x8x128xf32, #tpu.memory_space<vmem>>, vector<1x8x128xf32>
    %61 = vector.shape_cast %60 : vector<1x8x128xf32> to vector<8x128xf32>
    %c5_i32_22 = arith.constant 5 : i32
    %62 = vector.broadcast %c5_i32_22 : i32 to vector<8x128xi32>
    %63 = arith.cmpi eq, %1, %62 : vector<8x128xi32>
    %64 = arith.select %63, %61, %53 : vector<8x128xi1>, vector<8x128xf32>
    %c0_i32_23 = arith.constant 0 : i32
    %65 = arith.addi %0, %c0_i32_23 : i32
    %c6_i32 = arith.constant 6 : i32
    %66 = arith.addi %65, %c6_i32 : i32
    %67 = arith.index_cast %66 : i32 to index
    %68 = arith.index_cast %c0_i32 : i32 to index
    %69 = memref.load %arg1[%67, %68] : memref<8x4xi32, #tpu.memory_space<smem>>
    %70 = arith.index_cast %69 : i32 to index
    %c0_24 = arith.constant 0 : index
    %c0_25 = arith.constant 0 : index
    %71 = vector.load %arg2[%70, %c0_24, %c0_25] : memref<16x8x128xf32, #tpu.memory_space<vmem>>, vector<1x8x128xf32>
    %72 = vector.shape_cast %71 : vector<1x8x128xf32> to vector<8x128xf32>
    %c6_i32_26 = arith.constant 6 : i32
    %73 = vector.broadcast %c6_i32_26 : i32 to vector<8x128xi32>
    %74 = arith.cmpi eq, %1, %73 : vector<8x128xi32>
    %75 = arith.select %74, %72, %64 : vector<8x128xi1>, vector<8x128xf32>
    %c0_i32_27 = arith.constant 0 : i32
    %76 = arith.addi %0, %c0_i32_27 : i32
    %c7_i32 = arith.constant 7 : i32
    %77 = arith.addi %76, %c7_i32 : i32
    %78 = arith.index_cast %77 : i32 to index
    %79 = arith.index_cast %c0_i32 : i32 to index
    %80 = memref.load %arg1[%78, %79] : memref<8x4xi32, #tpu.memory_space<smem>>
    %81 = arith.index_cast %80 : i32 to index
    %c0_28 = arith.constant 0 : index
    %c0_29 = arith.constant 0 : index
    %82 = vector.load %arg2[%81, %c0_28, %c0_29] : memref<16x8x128xf32, #tpu.memory_space<vmem>>, vector<1x8x128xf32>
    %83 = vector.shape_cast %82 : vector<1x8x128xf32> to vector<8x128xf32>
    %c7_i32_30 = arith.constant 7 : i32
    %84 = vector.broadcast %c7_i32_30 : i32 to vector<8x128xi32>
    %85 = arith.cmpi eq, %1, %84 : vector<8x128xi32>
    %86 = arith.select %85, %83, %75 : vector<8x128xi1>, vector<8x128xf32>
    %87 = arith.index_cast %c0_i32 : i32 to index
    %c0_31 = arith.constant 0 : index
    %c0_32 = arith.constant 0 : index
    %88 = vector.load %arg3[%87, %c0_31, %c0_32] : memref<4x8x128xf32, #tpu.memory_space<vmem>>, vector<1x8x128xf32>
    %89 = vector.shape_cast %88 : vector<1x8x128xf32> to vector<8x128xf32>
    %90 = vector.shape_cast %86 : vector<8x128xf32> to vector<1x8x128xf32>
    tpu.vector_store %arg3[%87, %c0_31, %c0_32], %90 {strides = array<i32>} : memref<4x8x128xf32, #tpu.memory_space<vmem>>, vector<1x8x128xf32>,
    %c1_i32_33 = arith.constant 1 : i32
    %c0_i32_34 = arith.constant 0 : i32
    %91 = arith.addi %0, %c0_i32_34 : i32
    %c0_i32_35 = arith.constant 0 : i32
    %92 = arith.addi %91, %c0_i32_35 : i32
    %93 = arith.index_cast %92 : i32 to index
    %94 = arith.index_cast %c1_i32_33 : i32 to index
    %95 = memref.load %arg1[%93, %94] : memref<8x4xi32, #tpu.memory_space<smem>>
    %96 = arith.index_cast %95 : i32 to index
    %c0_36 = arith.constant 0 : index
    %c0_37 = arith.constant 0 : index
    %97 = vector.load %arg2[%96, %c0_36, %c0_37] : memref<16x8x128xf32, #tpu.memory_space<vmem>>, vector<1x8x128xf32>
    %98 = vector.shape_cast %97 : vector<1x8x128xf32> to vector<8x128xf32>
    %c0_i32_38 = arith.constant 0 : i32
    %99 = arith.addi %0, %c0_i32_38 : i32
    %c1_i32_39 = arith.constant 1 : i32
    %100 = arith.addi %99, %c1_i32_39 : i32
    %101 = arith.index_cast %100 : i32 to index
    %102 = arith.index_cast %c1_i32_33 : i32 to index
    %103 = memref.load %arg1[%101, %102] : memref<8x4xi32, #tpu.memory_space<smem>>
    %104 = arith.index_cast %103 : i32 to index
    %c0_40 = arith.constant 0 : index
    %c0_41 = arith.constant 0 : index
    %105 = vector.load %arg2[%104, %c0_40, %c0_41] : memref<16x8x128xf32, #tpu.memory_space<vmem>>, vector<1x8x128xf32>
    %106 = vector.shape_cast %105 : vector<1x8x128xf32> to vector<8x128xf32>
    %c1_i32_42 = arith.constant 1 : i32
    %107 = vector.broadcast %c1_i32_42 : i32 to vector<8x128xi32>
    %108 = arith.cmpi eq, %1, %107 : vector<8x128xi32>
    %109 = arith.select %108, %106, %98 : vector<8x128xi1>, vector<8x128xf32>
    %c0_i32_43 = arith.constant 0 : i32
    %110 = arith.addi %0, %c0_i32_43 : i32
    %c2_i32_44 = arith.constant 2 : i32
    %111 = arith.addi %110, %c2_i32_44 : i32
    %112 = arith.index_cast %111 : i32 to index
    %113 = arith.index_cast %c1_i32_33 : i32 to index
    %114 = memref.load %arg1[%112, %113] : memref<8x4xi32, #tpu.memory_space<smem>>
    %115 = arith.index_cast %114 : i32 to index
    %c0_45 = arith.constant 0 : index
    %c0_46 = arith.constant 0 : index
    %116 = vector.load %arg2[%115, %c0_45, %c0_46] : memref<16x8x128xf32, #tpu.memory_space<vmem>>, vector<1x8x128xf32>
    %117 = vector.shape_cast %116 : vector<1x8x128xf32> to vector<8x128xf32>
    %c2_i32_47 = arith.constant 2 : i32
    %118 = vector.broadcast %c2_i32_47 : i32 to vector<8x128xi32>
    %119 = arith.cmpi eq, %1, %118 : vector<8x128xi32>
    %120 = arith.select %119, %117, %109 : vector<8x128xi1>, vector<8x128xf32>
    %c0_i32_48 = arith.constant 0 : i32
    %121 = arith.addi %0, %c0_i32_48 : i32
    %c3_i32_49 = arith.constant 3 : i32
    %122 = arith.addi %121, %c3_i32_49 : i32
    %123 = arith.index_cast %122 : i32 to index
    %124 = arith.index_cast %c1_i32_33 : i32 to index
    %125 = memref.load %arg1[%123, %124] : memref<8x4xi32, #tpu.memory_space<smem>>
    %126 = arith.index_cast %125 : i32 to index
    %c0_50 = arith.constant 0 : index
    %c0_51 = arith.constant 0 : index
    %127 = vector.load %arg2[%126, %c0_50, %c0_51] : memref<16x8x128xf32, #tpu.memory_space<vmem>>, vector<1x8x128xf32>
    %128 = vector.shape_cast %127 : vector<1x8x128xf32> to vector<8x128xf32>
    %c3_i32_52 = arith.constant 3 : i32
    %129 = vector.broadcast %c3_i32_52 : i32 to vector<8x128xi32>
    %130 = arith.cmpi eq, %1, %129 : vector<8x128xi32>
    %131 = arith.select %130, %128, %120 : vector<8x128xi1>, vector<8x128xf32>
    %c0_i32_53 = arith.constant 0 : i32
    %132 = arith.addi %0, %c0_i32_53 : i32
    %c4_i32_54 = arith.constant 4 : i32
    %133 = arith.addi %132, %c4_i32_54 : i32
    %134 = arith.index_cast %133 : i32 to index
    %135 = arith.index_cast %c1_i32_33 : i32 to index
    %136 = memref.load %arg1[%134, %135] : memref<8x4xi32, #tpu.memory_space<smem>>
    %137 = arith.index_cast %136 : i32 to index
    %c0_55 = arith.constant 0 : index
    %c0_56 = arith.constant 0 : index
    %138 = vector.load %arg2[%137, %c0_55, %c0_56] : memref<16x8x128xf32, #tpu.memory_space<vmem>>, vector<1x8x128xf32>
    %139 = vector.shape_cast %138 : vector<1x8x128xf32> to vector<8x128xf32>
    %c4_i32_57 = arith.constant 4 : i32
    %140 = vector.broadcast %c4_i32_57 : i32 to vector<8x128xi32>
    %141 = arith.cmpi eq, %1, %140 : vector<8x128xi32>
    %142 = arith.select %141, %139, %131 : vector<8x128xi1>, vector<8x128xf32>
    %c0_i32_58 = arith.constant 0 : i32
    %143 = arith.addi %0, %c0_i32_58 : i32
    %c5_i32_59 = arith.constant 5 : i32
    %144 = arith.addi %143, %c5_i32_59 : i32
    %145 = arith.index_cast %144 : i32 to index
    %146 = arith.index_cast %c1_i32_33 : i32 to index
    %147 = memref.load %arg1[%145, %146] : memref<8x4xi32, #tpu.memory_space<smem>>
    %148 = arith.index_cast %147 : i32 to index
    %c0_60 = arith.constant 0 : index
    %c0_61 = arith.constant 0 : index
    %149 = vector.load %arg2[%148, %c0_60, %c0_61] : memref<16x8x128xf32, #tpu.memory_space<vmem>>, vector<1x8x128xf32>
    %150 = vector.shape_cast %149 : vector<1x8x128xf32> to vector<8x128xf32>
    %c5_i32_62 = arith.constant 5 : i32
    %151 = vector.broadcast %c5_i32_62 : i32 to vector<8x128xi32>
    %152 = arith.cmpi eq, %1, %151 : vector<8x128xi32>
    %153 = arith.select %152, %150, %142 : vector<8x128xi1>, vector<8x128xf32>
    %c0_i32_63 = arith.constant 0 : i32
    %154 = arith.addi %0, %c0_i32_63 : i32
    %c6_i32_64 = arith.constant 6 : i32
    %155 = arith.addi %154, %c6_i32_64 : i32
    %156 = arith.index_cast %155 : i32 to index
    %157 = arith.index_cast %c1_i32_33 : i32 to index
    %158 = memref.load %arg1[%156, %157] : memref<8x4xi32, #tpu.memory_space<smem>>
    %159 = arith.index_cast %158 : i32 to index
    %c0_65 = arith.constant 0 : index
    %c0_66 = arith.constant 0 : index
    %160 = vector.load %arg2[%159, %c0_65, %c0_66] : memref<16x8x128xf32, #tpu.memory_space<vmem>>, vector<1x8x128xf32>
    %161 = vector.shape_cast %160 : vector<1x8x128xf32> to vector<8x128xf32>
    %c6_i32_67 = arith.constant 6 : i32
    %162 = vector.broadcast %c6_i32_67 : i32 to vector<8x128xi32>
    %163 = arith.cmpi eq, %1, %162 : vector<8x128xi32>
    %164 = arith.select %163, %161, %153 : vector<8x128xi1>, vector<8x128xf32>
    %c0_i32_68 = arith.constant 0 : i32
    %165 = arith.addi %0, %c0_i32_68 : i32
    %c7_i32_69 = arith.constant 7 : i32
    %166 = arith.addi %165, %c7_i32_69 : i32
    %167 = arith.index_cast %166 : i32 to index
    %168 = arith.index_cast %c1_i32_33 : i32 to index
    %169 = memref.load %arg1[%167, %168] : memref<8x4xi32, #tpu.memory_space<smem>>
    %170 = arith.index_cast %169 : i32 to index
    %c0_70 = arith.constant 0 : index
    %c0_71 = arith.constant 0 : index
    %171 = vector.load %arg2[%170, %c0_70, %c0_71] : memref<16x8x128xf32, #tpu.memory_space<vmem>>, vector<1x8x128xf32>
    %172 = vector.shape_cast %171 : vector<1x8x128xf32> to vector<8x128xf32>
    %c7_i32_72 = arith.constant 7 : i32
    %173 = vector.broadcast %c7_i32_72 : i32 to vector<8x128xi32>
    %174 = arith.cmpi eq, %1, %173 : vector<8x128xi32>
    %175 = arith.select %174, %172, %164 : vector<8x128xi1>, vector<8x128xf32>
    %176 = arith.index_cast %c1_i32_33 : i32 to index
    %c0_73 = arith.constant 0 : index
    %c0_74 = arith.constant 0 : index
    %177 = vector.load %arg3[%176, %c0_73, %c0_74] : memref<4x8x128xf32, #tpu.memory_space<vmem>>, vector<1x8x128xf32>
    %178 = vector.shape_cast %177 : vector<1x8x128xf32> to vector<8x128xf32>
    %179 = vector.shape_cast %175 : vector<8x128xf32> to vector<1x8x128xf32>
    tpu.vector_store %arg3[%176, %c0_73, %c0_74], %179 {strides = array<i32>} : memref<4x8x128xf32, #tpu.memory_space<vmem>>, vector<1x8x128xf32>,
    %c2_i32_75 = arith.constant 2 : i32
    %c0_i32_76 = arith.constant 0 : i32
    %180 = arith.addi %0, %c0_i32_76 : i32
    %c0_i32_77 = arith.constant 0 : i32
    %181 = arith.addi %180, %c0_i32_77 : i32
    %182 = arith.index_cast %181 : i32 to index
    %183 = arith.index_cast %c2_i32_75 : i32 to index
    %184 = memref.load %arg1[%182, %183] : memref<8x4xi32, #tpu.memory_space<smem>>
    %185 = arith.index_cast %184 : i32 to index
    %c0_78 = arith.constant 0 : index
    %c0_79 = arith.constant 0 : index
    %186 = vector.load %arg2[%185, %c0_78, %c0_79] : memref<16x8x128xf32, #tpu.memory_space<vmem>>, vector<1x8x128xf32>
    %187 = vector.shape_cast %186 : vector<1x8x128xf32> to vector<8x128xf32>
    %c0_i32_80 = arith.constant 0 : i32
    %188 = arith.addi %0, %c0_i32_80 : i32
    %c1_i32_81 = arith.constant 1 : i32
    %189 = arith.addi %188, %c1_i32_81 : i32
    %190 = arith.index_cast %189 : i32 to index
    %191 = arith.index_cast %c2_i32_75 : i32 to index
    %192 = memref.load %arg1[%190, %191] : memref<8x4xi32, #tpu.memory_space<smem>>
    %193 = arith.index_cast %192 : i32 to index
    %c0_82 = arith.constant 0 : index
    %c0_83 = arith.constant 0 : index
    %194 = vector.load %arg2[%193, %c0_82, %c0_83] : memref<16x8x128xf32, #tpu.memory_space<vmem>>, vector<1x8x128xf32>
    %195 = vector.shape_cast %194 : vector<1x8x128xf32> to vector<8x128xf32>
    %c1_i32_84 = arith.constant 1 : i32
    %196 = vector.broadcast %c1_i32_84 : i32 to vector<8x128xi32>
    %197 = arith.cmpi eq, %1, %196 : vector<8x128xi32>
    %198 = arith.select %197, %195, %187 : vector<8x128xi1>, vector<8x128xf32>
    %c0_i32_85 = arith.constant 0 : i32
    %199 = arith.addi %0, %c0_i32_85 : i32
    %c2_i32_86 = arith.constant 2 : i32
    %200 = arith.addi %199, %c2_i32_86 : i32
    %201 = arith.index_cast %200 : i32 to index
    %202 = arith.index_cast %c2_i32_75 : i32 to index
    %203 = memref.load %arg1[%201, %202] : memref<8x4xi32, #tpu.memory_space<smem>>
    %204 = arith.index_cast %203 : i32 to index
    %c0_87 = arith.constant 0 : index
    %c0_88 = arith.constant 0 : index
    %205 = vector.load %arg2[%204, %c0_87, %c0_88] : memref<16x8x128xf32, #tpu.memory_space<vmem>>, vector<1x8x128xf32>
    %206 = vector.shape_cast %205 : vector<1x8x128xf32> to vector<8x128xf32>
    %c2_i32_89 = arith.constant 2 : i32
    %207 = vector.broadcast %c2_i32_89 : i32 to vector<8x128xi32>
    %208 = arith.cmpi eq, %1, %207 : vector<8x128xi32>
    %209 = arith.select %208, %206, %198 : vector<8x128xi1>, vector<8x128xf32>
    %c0_i32_90 = arith.constant 0 : i32
    %210 = arith.addi %0, %c0_i32_90 : i32
    %c3_i32_91 = arith.constant 3 : i32
    %211 = arith.addi %210, %c3_i32_91 : i32
    %212 = arith.index_cast %211 : i32 to index
    %213 = arith.index_cast %c2_i32_75 : i32 to index
    %214 = memref.load %arg1[%212, %213] : memref<8x4xi32, #tpu.memory_space<smem>>
    %215 = arith.index_cast %214 : i32 to index
    %c0_92 = arith.constant 0 : index
    %c0_93 = arith.constant 0 : index
    %216 = vector.load %arg2[%215, %c0_92, %c0_93] : memref<16x8x128xf32, #tpu.memory_space<vmem>>, vector<1x8x128xf32>
    %217 = vector.shape_cast %216 : vector<1x8x128xf32> to vector<8x128xf32>
    %c3_i32_94 = arith.constant 3 : i32
    %218 = vector.broadcast %c3_i32_94 : i32 to vector<8x128xi32>
    %219 = arith.cmpi eq, %1, %218 : vector<8x128xi32>
    %220 = arith.select %219, %217, %209 : vector<8x128xi1>, vector<8x128xf32>
    %c0_i32_95 = arith.constant 0 : i32
    %221 = arith.addi %0, %c0_i32_95 : i32
    %c4_i32_96 = arith.constant 4 : i32
    %222 = arith.addi %221, %c4_i32_96 : i32
    %223 = arith.index_cast %222 : i32 to index
    %224 = arith.index_cast %c2_i32_75 : i32 to index
    %225 = memref.load %arg1[%223, %224] : memref<8x4xi32, #tpu.memory_space<smem>>
    %226 = arith.index_cast %225 : i32 to index
    %c0_97 = arith.constant 0 : index
    %c0_98 = arith.constant 0 : index
    %227 = vector.load %arg2[%226, %c0_97, %c0_98] : memref<16x8x128xf32, #tpu.memory_space<vmem>>, vector<1x8x128xf32>
    %228 = vector.shape_cast %227 : vector<1x8x128xf32> to vector<8x128xf32>
    %c4_i32_99 = arith.constant 4 : i32
    %229 = vector.broadcast %c4_i32_99 : i32 to vector<8x128xi32>
    %230 = arith.cmpi eq, %1, %229 : vector<8x128xi32>
    %231 = arith.select %230, %228, %220 : vector<8x128xi1>, vector<8x128xf32>
    %c0_i32_100 = arith.constant 0 : i32
    %232 = arith.addi %0, %c0_i32_100 : i32
    %c5_i32_101 = arith.constant 5 : i32
    %233 = arith.addi %232, %c5_i32_101 : i32
    %234 = arith.index_cast %233 : i32 to index
    %235 = arith.index_cast %c2_i32_75 : i32 to index
    %236 = memref.load %arg1[%234, %235] : memref<8x4xi32, #tpu.memory_space<smem>>
    %237 = arith.index_cast %236 : i32 to index
    %c0_102 = arith.constant 0 : index
    %c0_103 = arith.constant 0 : index
    %238 = vector.load %arg2[%237, %c0_102, %c0_103] : memref<16x8x128xf32, #tpu.memory_space<vmem>>, vector<1x8x128xf32>
    %239 = vector.shape_cast %238 : vector<1x8x128xf32> to vector<8x128xf32>
    %c5_i32_104 = arith.constant 5 : i32
    %240 = vector.broadcast %c5_i32_104 : i32 to vector<8x128xi32>
    %241 = arith.cmpi eq, %1, %240 : vector<8x128xi32>
    %242 = arith.select %241, %239, %231 : vector<8x128xi1>, vector<8x128xf32>
    %c0_i32_105 = arith.constant 0 : i32
    %243 = arith.addi %0, %c0_i32_105 : i32
    %c6_i32_106 = arith.constant 6 : i32
    %244 = arith.addi %243, %c6_i32_106 : i32
    %245 = arith.index_cast %244 : i32 to index
    %246 = arith.index_cast %c2_i32_75 : i32 to index
    %247 = memref.load %arg1[%245, %246] : memref<8x4xi32, #tpu.memory_space<smem>>
    %248 = arith.index_cast %247 : i32 to index
    %c0_107 = arith.constant 0 : index
    %c0_108 = arith.constant 0 : index
    %249 = vector.load %arg2[%248, %c0_107, %c0_108] : memref<16x8x128xf32, #tpu.memory_space<vmem>>, vector<1x8x128xf32>
    %250 = vector.shape_cast %249 : vector<1x8x128xf32> to vector<8x128xf32>
    %c6_i32_109 = arith.constant 6 : i32
    %251 = vector.broadcast %c6_i32_109 : i32 to vector<8x128xi32>
    %252 = arith.cmpi eq, %1, %251 : vector<8x128xi32>
    %253 = arith.select %252, %250, %242 : vector<8x128xi1>, vector<8x128xf32>
    %c0_i32_110 = arith.constant 0 : i32
    %254 = arith.addi %0, %c0_i32_110 : i32
    %c7_i32_111 = arith.constant 7 : i32
    %255 = arith.addi %254, %c7_i32_111 : i32
    %256 = arith.index_cast %255 : i32 to index
    %257 = arith.index_cast %c2_i32_75 : i32 to index
    %258 = memref.load %arg1[%256, %257] : memref<8x4xi32, #tpu.memory_space<smem>>
    %259 = arith.index_cast %258 : i32 to index
    %c0_112 = arith.constant 0 : index
    %c0_113 = arith.constant 0 : index
    %260 = vector.load %arg2[%259, %c0_112, %c0_113] : memref<16x8x128xf32, #tpu.memory_space<vmem>>, vector<1x8x128xf32>
    %261 = vector.shape_cast %260 : vector<1x8x128xf32> to vector<8x128xf32>
    %c7_i32_114 = arith.constant 7 : i32
    %262 = vector.broadcast %c7_i32_114 : i32 to vector<8x128xi32>
    %263 = arith.cmpi eq, %1, %262 : vector<8x128xi32>
    %264 = arith.select %263, %261, %253 : vector<8x128xi1>, vector<8x128xf32>
    %265 = arith.index_cast %c2_i32_75 : i32 to index
    %c0_115 = arith.constant 0 : index
    %c0_116 = arith.constant 0 : index
    %266 = vector.load %arg3[%265, %c0_115, %c0_116] : memref<4x8x128xf32, #tpu.memory_space<vmem>>, vector<1x8x128xf32>
    %267 = vector.shape_cast %266 : vector<1x8x128xf32> to vector<8x128xf32>
    %268 = vector.shape_cast %264 : vector<8x128xf32> to vector<1x8x128xf32>
    tpu.vector_store %arg3[%265, %c0_115, %c0_116], %268 {strides = array<i32>} : memref<4x8x128xf32, #tpu.memory_space<vmem>>, vector<1x8x128xf32>,
    %c3_i32_117 = arith.constant 3 : i32
    %c0_i32_118 = arith.constant 0 : i32
    %269 = arith.addi %0, %c0_i32_118 : i32
    %c0_i32_119 = arith.constant 0 : i32
    %270 = arith.addi %269, %c0_i32_119 : i32
    %271 = arith.index_cast %270 : i32 to index
    %272 = arith.index_cast %c3_i32_117 : i32 to index
    %273 = memref.load %arg1[%271, %272] : memref<8x4xi32, #tpu.memory_space<smem>>
    %274 = arith.index_cast %273 : i32 to index
    %c0_120 = arith.constant 0 : index
    %c0_121 = arith.constant 0 : index
    %275 = vector.load %arg2[%274, %c0_120, %c0_121] : memref<16x8x128xf32, #tpu.memory_space<vmem>>, vector<1x8x128xf32>
    %276 = vector.shape_cast %275 : vector<1x8x128xf32> to vector<8x128xf32>
    %c0_i32_122 = arith.constant 0 : i32
    %277 = arith.addi %0, %c0_i32_122 : i32
    %c1_i32_123 = arith.constant 1 : i32
    %278 = arith.addi %277, %c1_i32_123 : i32
    %279 = arith.index_cast %278 : i32 to index
    %280 = arith.index_cast %c3_i32_117 : i32 to index
    %281 = memref.load %arg1[%279, %280] : memref<8x4xi32, #tpu.memory_space<smem>>
    %282 = arith.index_cast %281 : i32 to index
    %c0_124 = arith.constant 0 : index
    %c0_125 = arith.constant 0 : index
    %283 = vector.load %arg2[%282, %c0_124, %c0_125] : memref<16x8x128xf32, #tpu.memory_space<vmem>>, vector<1x8x128xf32>
    %284 = vector.shape_cast %283 : vector<1x8x128xf32> to vector<8x128xf32>
    %c1_i32_126 = arith.constant 1 : i32
    %285 = vector.broadcast %c1_i32_126 : i32 to vector<8x128xi32>
    %286 = arith.cmpi eq, %1, %285 : vector<8x128xi32>
    %287 = arith.select %286, %284, %276 : vector<8x128xi1>, vector<8x128xf32>
    %c0_i32_127 = arith.constant 0 : i32
    %288 = arith.addi %0, %c0_i32_127 : i32
    %c2_i32_128 = arith.constant 2 : i32
    %289 = arith.addi %288, %c2_i32_128 : i32
    %290 = arith.index_cast %289 : i32 to index
    %291 = arith.index_cast %c3_i32_117 : i32 to index
    %292 = memref.load %arg1[%290, %291] : memref<8x4xi32, #tpu.memory_space<smem>>
    %293 = arith.index_cast %292 : i32 to index
    %c0_129 = arith.constant 0 : index
    %c0_130 = arith.constant 0 : index
    %294 = vector.load %arg2[%293, %c0_129, %c0_130] : memref<16x8x128xf32, #tpu.memory_space<vmem>>, vector<1x8x128xf32>
    %295 = vector.shape_cast %294 : vector<1x8x128xf32> to vector<8x128xf32>
    %c2_i32_131 = arith.constant 2 : i32
    %296 = vector.broadcast %c2_i32_131 : i32 to vector<8x128xi32>
    %297 = arith.cmpi eq, %1, %296 : vector<8x128xi32>
    %298 = arith.select %297, %295, %287 : vector<8x128xi1>, vector<8x128xf32>
    %c0_i32_132 = arith.constant 0 : i32
    %299 = arith.addi %0, %c0_i32_132 : i32
    %c3_i32_133 = arith.constant 3 : i32
    %300 = arith.addi %299, %c3_i32_133 : i32
    %301 = arith.index_cast %300 : i32 to index
    %302 = arith.index_cast %c3_i32_117 : i32 to index
    %303 = memref.load %arg1[%301, %302] : memref<8x4xi32, #tpu.memory_space<smem>>
    %304 = arith.index_cast %303 : i32 to index
    %c0_134 = arith.constant 0 : index
    %c0_135 = arith.constant 0 : index
    %305 = vector.load %arg2[%304, %c0_134, %c0_135] : memref<16x8x128xf32, #tpu.memory_space<vmem>>, vector<1x8x128xf32>
    %306 = vector.shape_cast %305 : vector<1x8x128xf32> to vector<8x128xf32>
    %c3_i32_136 = arith.constant 3 : i32
    %307 = vector.broadcast %c3_i32_136 : i32 to vector<8x128xi32>
    %308 = arith.cmpi eq, %1, %307 : vector<8x128xi32>
    %309 = arith.select %308, %306, %298 : vector<8x128xi1>, vector<8x128xf32>
    %c0_i32_137 = arith.constant 0 : i32
    %310 = arith.addi %0, %c0_i32_137 : i32
    %c4_i32_138 = arith.constant 4 : i32
    %311 = arith.addi %310, %c4_i32_138 : i32
    %312 = arith.index_cast %311 : i32 to index
    %313 = arith.index_cast %c3_i32_117 : i32 to index
    %314 = memref.load %arg1[%312, %313] : memref<8x4xi32, #tpu.memory_space<smem>>
    %315 = arith.index_cast %314 : i32 to index
    %c0_139 = arith.constant 0 : index
    %c0_140 = arith.constant 0 : index
    %316 = vector.load %arg2[%315, %c0_139, %c0_140] : memref<16x8x128xf32, #tpu.memory_space<vmem>>, vector<1x8x128xf32>
    %317 = vector.shape_cast %316 : vector<1x8x128xf32> to vector<8x128xf32>
    %c4_i32_141 = arith.constant 4 : i32
    %318 = vector.broadcast %c4_i32_141 : i32 to vector<8x128xi32>
    %319 = arith.cmpi eq, %1, %318 : vector<8x128xi32>
    %320 = arith.select %319, %317, %309 : vector<8x128xi1>, vector<8x128xf32>
    %c0_i32_142 = arith.constant 0 : i32
    %321 = arith.addi %0, %c0_i32_142 : i32
    %c5_i32_143 = arith.constant 5 : i32
    %322 = arith.addi %321, %c5_i32_143 : i32
    %323 = arith.index_cast %322 : i32 to index
    %324 = arith.index_cast %c3_i32_117 : i32 to index
    %325 = memref.load %arg1[%323, %324] : memref<8x4xi32, #tpu.memory_space<smem>>
    %326 = arith.index_cast %325 : i32 to index
    %c0_144 = arith.constant 0 : index
    %c0_145 = arith.constant 0 : index
    %327 = vector.load %arg2[%326, %c0_144, %c0_145] : memref<16x8x128xf32, #tpu.memory_space<vmem>>, vector<1x8x128xf32>
    %328 = vector.shape_cast %327 : vector<1x8x128xf32> to vector<8x128xf32>
    %c5_i32_146 = arith.constant 5 : i32
    %329 = vector.broadcast %c5_i32_146 : i32 to vector<8x128xi32>
    %330 = arith.cmpi eq, %1, %329 : vector<8x128xi32>
    %331 = arith.select %330, %328, %320 : vector<8x128xi1>, vector<8x128xf32>
    %c0_i32_147 = arith.constant 0 : i32
    %332 = arith.addi %0, %c0_i32_147 : i32
    %c6_i32_148 = arith.constant 6 : i32
    %333 = arith.addi %332, %c6_i32_148 : i32
    %334 = arith.index_cast %333 : i32 to index
    %335 = arith.index_cast %c3_i32_117 : i32 to index
    %336 = memref.load %arg1[%334, %335] : memref<8x4xi32, #tpu.memory_space<smem>>
    %337 = arith.index_cast %336 : i32 to index
    %c0_149 = arith.constant 0 : index
    %c0_150 = arith.constant 0 : index
    %338 = vector.load %arg2[%337, %c0_149, %c0_150] : memref<16x8x128xf32, #tpu.memory_space<vmem>>, vector<1x8x128xf32>
    %339 = vector.shape_cast %338 : vector<1x8x128xf32> to vector<8x128xf32>
    %c6_i32_151 = arith.constant 6 : i32
    %340 = vector.broadcast %c6_i32_151 : i32 to vector<8x128xi32>
    %341 = arith.cmpi eq, %1, %340 : vector<8x128xi32>
    %342 = arith.select %341, %339, %331 : vector<8x128xi1>, vector<8x128xf32>
    %c0_i32_152 = arith.constant 0 : i32
    %343 = arith.addi %0, %c0_i32_152 : i32
    %c7_i32_153 = arith.constant 7 : i32
    %344 = arith.addi %343, %c7_i32_153 : i32
    %345 = arith.index_cast %344 : i32 to index
    %346 = arith.index_cast %c3_i32_117 : i32 to index
    %347 = memref.load %arg1[%345, %346] : memref<8x4xi32, #tpu.memory_space<smem>>
    %348 = arith.index_cast %347 : i32 to index
    %c0_154 = arith.constant 0 : index
    %c0_155 = arith.constant 0 : index
    %349 = vector.load %arg2[%348, %c0_154, %c0_155] : memref<16x8x128xf32, #tpu.memory_space<vmem>>, vector<1x8x128xf32>
    %350 = vector.shape_cast %349 : vector<1x8x128xf32> to vector<8x128xf32>
    %c7_i32_156 = arith.constant 7 : i32
    %351 = vector.broadcast %c7_i32_156 : i32 to vector<8x128xi32>
    %352 = arith.cmpi eq, %1, %351 : vector<8x128xi32>
    %353 = arith.select %352, %350, %342 : vector<8x128xi1>, vector<8x128xf32>
    %354 = arith.index_cast %c3_i32_117 : i32 to index
    %c0_157 = arith.constant 0 : index
    %c0_158 = arith.constant 0 : index
    %355 = vector.load %arg3[%354, %c0_157, %c0_158] : memref<4x8x128xf32, #tpu.memory_space<vmem>>, vector<1x8x128xf32>
    %356 = vector.shape_cast %355 : vector<1x8x128xf32> to vector<8x128xf32>
    %357 = vector.shape_cast %353 : vector<8x128xf32> to vector<1x8x128xf32>
    tpu.vector_store %arg3[%354, %c0_157, %c0_158], %357 {strides = array<i32>} : memref<4x8x128xf32, #tpu.memory_space<vmem>>, vector<1x8x128xf32>,
    %c4_i32_159 = arith.constant 4 : i32
    return
  }
  func.func @transform_0(%arg0: i32, %arg1: memref<8x4xi32, #tpu.memory_space<smem>>) -> (i32, i32, i32) {
    %c0_i32 = arith.constant 0 : i32
    %c0_i32_0 = arith.constant 0 : i32
    %c0_i32_1 = arith.constant 0 : i32
    return %c0_i32, %arg0, %c0_i32_0 : i32, i32, i32
  }
  func.func @transform_1(%arg0: i32, %arg1: memref<8x4xi32, #tpu.memory_space<smem>>) -> (i32, i32, i32) {
    %c0_i32 = arith.constant 0 : i32
    %c0_i32_0 = arith.constant 0 : i32
    %c0_i32_1 = arith.constant 0 : i32
    return %c0_i32, %arg0, %c0_i32_0 : i32, i32, i32
  }
}

</mosaic_0001>

<bundles_post_ra>
// kernel: tpu_custom_call.1
= control target key start
LH: loop header
LB: loop body
LE: loop exit
PB: predicated region body
PF: predicated region fallthrough
CT: control target
= control target key end

     0   :  { %s631_s0 = inlined_call_operand.vmem [shape: s32[8,4], index: 0, kind: input, shape index: {}]   ;;  %s632_s1 = inlined_call_operand.hbm [shape: f32[16,8,128], index: 1, kind: input, shape index: {}]   ;;  %s633_s2 = inlined_call_operand.hbm [shape: f32[4,8,128], index: 2, kind: output, shape index: {}]  }
   0x1   :  { %s7_s11 = sshll.u32 %s631_s0, 4  ;;  %s8_s11 = int_to_ptr.vmem [resolvable:$true] %s7_s11 }
   0x2   :  { %s391_s12 = scalar_lea.vmem %s8_s11, 128  ;;  %p396_p1 = scmp.lt.s32.totalorder %s8_s11, %s8_s11 }
   0x3   :  { %p392_p0 = scmp.ne.s32.totalorder %s8_s11, %s391_s12  ;;  %p397_p2 = scmp.lt.s32.totalorder %s391_s12, %s391_s12 }
   0x5   :  { %p398_p3 = por %p397_p2, %p396_p1 }
   0x7   :  { %p399_p4 = pnand %p398_p3, %p392_p0 }
   0x9   :  { %402 = shalt.err (!%p399_p4)  }
   0xa   :  { %s453_s13 = smov [#allocation3]  }
   0xb   :  { %10 = dma.vmem_to_smem %s8_s11, 128, %s453_s13, [#allocation2] }
   0xc   :  { %447 = dma.done.wait [#allocation2], 128 }
   0xd   :  { %448 = vsyncadd [#allocation2], 4294967168 }
   0xe   :  { %12 = sfence }
   0xf   :  { %13 = vsyncpa [#allocation5], 0 }
  0x10   :  { %14 = vsyncpa [#allocation6], 0  ;;  %s454_s14 = smov [#allocation4]   ;;  %s403_s17 = scalar_lea.hbm %s632_s1, 2048 }
  0x11   :  { %s20_s15 = sshll.u32 %s454_s14, 4  ;;  %p404_p5 = scmp.ne.s32.totalorder %s632_s1, %s403_s17  ;;  %s21_s15 = int_to_ptr.vmem [resolvable:$true] %s20_s15 }
  0x12   :  { %p407_p6 = scmp.lt.u32.totalorder %s403_s17, %s632_s1 }
  0x14   :  { %p409_p7 = pnand %p407_p6, %p404_p5 }
  0x16   :  { %412 = shalt.err (!%p409_p7)
}
  0x17   :  { %s413_s22 = scalar_lea.vmem %s21_s15, 2048  ;;  %p418_p9 = scmp.lt.s32.totalorder %s21_s15, %s21_s15 }
  0x18   :  { %p414_p8 = scmp.ne.s32.totalorder %s21_s15, %s413_s22  ;;  %p419_p10 = scmp.lt.s32.totalorder %s413_s22, %s413_s22 }
  0x1a   :  { %p420_p11 = por %p419_p10, %p418_p9 }
  0x1c   :  { %p421_p12 = pnand %p420_p11, %p414_p8 }
  0x1e   :  { %424 = shalt.err (!%p421_p12)
}
  0x1f   :  { %s455_s23 = smov 128   ;;  %s456_s24 = smov 8  }
  0x20   :  { %26 = dma.hbm_to_vmem [thread:$0]  %s632_s1, 2048, %s21_s15, [#allocation5], %s455_s23, %s455_s23, %s456_s24  }
  0x21   :  { %449 = dma.done.wait [#allocation5], 2048  }
  0x22   :  { %450 = vsyncadd [#allocation5], 4294965248  ;;  %v31_v0 = vlaneseq  ;;  %s34_s27 = sld [smem:[#allocation3]]  ;;  %s499_s7 = sld [smem:[#allocation3 + $0x1]] }
  0x23   :  { %s324_s28 = sld [smem:[#allocation3 + $0x80]]  ;;  %s501_s8 = sld [smem:[#allocation3 + $0x81]] }
  0x24   :  { %s326_s29 = sld [smem:[#allocation3 + $0x100]]  ;;  %v491_v1 = vshrl.u32 %v31_v0, 7 }
  0x25   :  { %s328_s30 = sld [smem:[#allocation3 + $0x180]] }
  0x26   :  { %s330_s3 = sld [smem:[#allocation3 + $0x200]]  ;;  %vm44_vm0 = vcmp.eq.s32.totalorder %v491_v1, 1  ;;  %vm52_vm1 = vcmp.eq.s32.totalorder %v491_v1, 2  ;;  %vm60_vm2 = vcmp.eq.s32.totalorder %v491_v1, 3  ;;  %vm68_vm3 = vcmp.eq.s32.totalorder %v491_v1, 4 }
  0x27   :  { %s493_s4 = sld [smem:[#allocation3 + $0x280]]  ;;  %vm76_vm4 = vcmp.eq.s32.totalorder %v491_v1, 5  ;;  %vm84_vm5 = vcmp.eq.s32.totalorder %v491_v1, 6  ;;  %vm92_vm6 = vcmp.eq.s32.totalorder %v491_v1, 7 }
  0x28   :  { %s495_s5 = sld [smem:[#allocation3 + $0x300]]  ;;  %s323_s1 = sshll.u32 %s34_s27, 3 }
  0x29   :  { %s497_s6 = sld [smem:[#allocation3 + $0x380]]  ;;  %s325_s9 = sshll.u32 %s324_s28, 3 }
  0x2a   :  { %s36_s10 = scalar_lea.vmem [#allocation4], %s323_s1  ;;  %s42_s11 = scalar_lea.vmem [#allocation4], %s325_s9 }
  0x2b   :  { %v37_v2 = vld [vmem:[%s36_s10] sm:$0xff]  ;;  %s327_s12 = sshll.u32 %s326_s29, 3  ;;  %s329_s13 = sshll.u32 %s328_s30, 3 }
  0x2c   :  { %v43_v3 = vld [vmem:[%s42_s11] sm:$0xff]  ;;  %s50_s14 = scalar_lea.vmem [#allocation4], %s327_s12  ;;  %s58_s15 = scalar_lea.vmem [#allocation4], %s329_s13 }
  0x2d   :  { %v45_v4 = vsel %vm44_vm0, %v43_v3, %v37_v2  ;;  %v51_v5 = vld [vmem:[%s50_s14] sm:$0xff]  ;;  %s331_s16 = sshll.u32 %s330_s3, 3  ;;  %s333_s0 = sshll.u32 %s493_s4, 3 }
  0x2e   :  { %v59_v6 = vld [vmem:[%s58_s15] sm:$0xff]  ;;  %v53_v7 = vsel %vm52_vm1, %v51_v5, %v45_v4  ;;  %s66_s17 = scalar_lea.vmem [#allocation4], %s331_s16  ;;  %s74_s18 = scalar_lea.vmem [#allocation4], %s333_s0 }
  0x2f   :  { %v61_v8 = vsel %vm60_vm2, %v59_v6, %v53_v7  ;;  %v67_v9 = vld [vmem:[%s66_s17] sm:$0xff]  ;;  %s335_s19 = sshll.u32 %s495_s5, 3  ;;  %s337_s20 = sshll.u32 %s497_s6, 3 }
  0x30   :  { %v75_v10 = vld [vmem:[%s74_s18] sm:$0xff]  ;;  %v69_v11 = vsel %vm68_vm3, %v67_v9, %v61_v8  ;;  %s82_s21 = scalar_lea.vmem [#allocation4], %s335_s19  ;;  %s90_s22 = scalar_lea.vmem [#allocation4], %s337_s20 }
  0x31   :  { %v77_v12 = vsel %vm76_vm4, %v75_v10, %v69_v11  ;;  %v83_v13 = vld [vmem:[%s82_s21] sm:$0xff]  ;;  %s339_s25 = sshll.u32 %s499_s7, 3  ;;  %s341_s26 = sshll.u32 %s501_s8, 3 }
  0x32   :  { %v91_v14 = vld [vmem:[%s90_s22] sm:$0xff]  ;;  %v85_v15 = vsel %vm84_vm5, %v83_v13, %v77_v12  ;;  %s342_s27 = sld [smem:[#allocation3 + $0x101]]  ;;  %s98_s5 = scalar_lea.vmem [#allocation4], %s339_s25 }
  0x33   :  { %v93_v16 = vsel %vm92_vm6, %v91_v14, %v85_v15  ;;  %s344_s28 = sld [smem:[#allocation3 + $0x181]]  ;;  %v99_v17 = vld [vmem:[%s98_s5] sm:$0xff]  ;;  %s103_s6 = scalar_lea.vmem [#allocation4], %s341_s26 }
  0x34   :  { %94 = vst [vmem:[#allocation7] sm:$0xff] %v93_v16  ;;  %s346_s29 = sld [smem:[#allocation3 + $0x201]]  ;;  %v104_v18 = vld [vmem:[%s103_s6] sm:$0xff]  ;;  %s533_s7 = sld [smem:[#allocation3 + $0x2]] }
  0x35   :  { %s348_s30 = sld [smem:[#allocation3 + $0x281]]  ;;  %s535_s8 = sld [smem:[#allocation3 + $0x82]]  ;;  %v105_v19 = vsel %vm44_vm0, %v104_v18, %v99_v17 }
  0x36   :  { %s529_s3 = sld [smem:[#allocation3 + $0x301]]  ;;  %s537_s1 = sld [smem:[#allocation3 + $0x102]] }
  0x37   :  { %s531_s4 = sld [smem:[#allocation3 + $0x381]]  ;;  %s539_s9 = sld [smem:[#allocation3 + $0x182]] }
  0x38   :  { %s541_s10 = sld [smem:[#allocation3 + $0x202]]  ;;  %s343_s12 = sshll.u32 %s342_s27, 3 }
  0x39   :  { %s543_s11 = sld [smem:[#allocation3 + $0x282]]  ;;  %s345_s13 = sshll.u32 %s344_s28, 3 }
  0x3a   :  { %s109_s14 = scalar_lea.vmem [#allocation4], %s343_s12  ;;  %s115_s15 = scalar_lea.vmem [#allocation4], %s345_s13 }
  0x3b   :  { %v110_v20 = vld [vmem:[%s109_s14] sm:$0xff]  ;;  %s347_s16 = sshll.u32 %s346_s29, 3  ;;  %s349_s0 = sshll.u32 %s348_s30, 3 }
  0x3c   :  { %v116_v21 = vld [vmem:[%s115_s15] sm:$0xff]  ;;  %v111_v22 = vsel %vm52_vm1, %v110_v20, %v105_v19  ;;  %s121_s17 = scalar_lea.vmem [#allocation4], %s347_s16  ;;  %s127_s18 = scalar_lea.vmem [#allocation4], %s349_s0 }
  0x3d   :  { %v117_v23 = vsel %vm60_vm2, %v116_v21, %v111_v22  ;;  %v122_v24 = vld [vmem:[%s121_s17] sm:$0xff]  ;;  %s351_s19 = sshll.u32 %s529_s3, 3  ;;  %s353_s20 = sshll.u32 %s531_s4, 3 }
  0x3e   :  { %v128_v25 = vld [vmem:[%s127_s18] sm:$0xff]  ;;  %v123_v26 = vsel %vm68_vm3, %v122_v24, %v117_v23  ;;  %s133_s21 = scalar_lea.vmem [#allocation4], %s351_s19  ;;  %s139_s22 = scalar_lea.vmem [#allocation4], %s353_s20 }
  0x3f   :  { %v129_v27 = vsel %vm76_vm4, %v128_v25, %v123_v26  ;;  %v134_v28 = vld [vmem:[%s133_s21] sm:$0xff]  ;;  %s355_s25 = sshll.u32 %s533_s7, 3  ;;  %s357_s26 = sshll.u32 %s535_s8, 3 }
  0x40   :  { %v140_v29 = vld [vmem:[%s139_s22] sm:$0xff]  ;;  %v135_v30 = vsel %vm84_vm5, %v134_v28, %v129_v27  ;;  %s147_s27 = scalar_lea.vmem [#allocation4], %s355_s25  ;;  %s152_s28 = scalar_lea.vmem [#allocation4], %s357_s26 }
  0x41   :  { %v141_v31 = vsel %vm92_vm6, %v140_v29, %v135_v30  ;;  %v148_v32 = vld [vmem:[%s147_s27] sm:$0xff]  ;;  %s359_s29 = sshll.u32 %s537_s1, 3  ;;  %s361_s30 = sshll.u32 %s539_s9, 3 }
  0x42   :  { %v153_v33 = vld [vmem:[%s152_s28] sm:$0xff]  ;;  %143 = vst [vmem:[#allocation7 + $0x8] sm:$0xff] %v141_v31  ;;  %s158_s3 = scalar_lea.vmem [#allocation4], %s359_s29  ;;  %s164_s4 = scalar_lea.vmem [#allocation4], %s361_s30 }
  0x43   :  { %v154_v34 = vsel %vm44_vm0, %v153_v33, %v148_v32  ;;  %v159_v35 = vld [vmem:[%s158_s3] sm:$0xff]  ;;  %s363_s5 = sshll.u32 %s541_s10, 3  ;;  %s365_s6 = sshll.u32 %s543_s11, 3 }
  0x44   :  { %v165_v36 = vld [vmem:[%s164_s4] sm:$0xff]  ;;  %v160_v37 = vsel %vm52_vm1, %v159_v35, %v154_v34  ;;  %s170_s7 = scalar_lea.vmem [#allocation4], %s363_s5  ;;  %s366_s8 = sld [smem:[#allocation3 + $0x302]] }
  0x45   :  { %v166_v38 = vsel %vm60_vm2, %v165_v36, %v160_v37  ;;  %v171_v39 = vld [vmem:[%s170_s7] sm:$0xff]  ;;  %s368_s1 = sld [smem:[#allocation3 + $0x382]]  ;;  %s370_s9 = sld [smem:[#allocation3 + $0x3]] }
  0x46   :  { %s372_s12 = sld [smem:[#allocation3 + $0x83]]  ;;  %v172_v40 = vsel %vm68_vm3, %v171_v39, %v166_v38  ;;  %s176_s10 = scalar_lea.vmem [#allocation4], %s365_s6 }
  0x47   :  { %s573_s13 = sld [smem:[#allocation3 + $0x103]]  ;;  %v177_v41 = vld [vmem:[%s176_s10] sm:$0xff]  ;;  %s457_s11 = smov [#allocation7]  }
  0x48   :  { %s575_s14 = sld [smem:[#allocation3 + $0x183]]  ;;  %s579_s15 = sshll.u32 %s457_s11, 4  ;;  %v178_v42 = vsel %vm76_vm4, %v177_v41, %v172_v40  ;;  %s248_s15 = int_to_ptr.vmem [resolvable:$true] %s579_s15 }
  0x49   :  { %s581_s16 = sld [smem:[#allocation3 + $0x203]]  ;;  %p430_p0 = scmp.lt.s32.totalorder %s248_s15, %s248_s15 }
  0x4a   :  { %s583_s0 = sld [smem:[#allocation3 + $0x283]]  ;;  %s367_s19 = sshll.u32 %s366_s8, 3 }
  0x4b   :  { %s585_s17 = sld [smem:[#allocation3 + $0x303]]  ;;  %s369_s20 = sshll.u32 %s368_s1, 3 }
  0x4c   :  { %s587_s18 = sld [smem:[#allocation3 + $0x383]]  ;;  %s182_s21 = scalar_lea.vmem [#allocation4], %s367_s19 }
  0x4d   :  { %v183_v43 = vld [vmem:[%s182_s21] sm:$0xff]  ;;  %s188_s22 = scalar_lea.vmem [#allocation4], %s369_s20  ;;  %s371_s25 = sshll.u32 %s370_s9, 3 }
  0x4e   :  { %v189_v44 = vld [vmem:[%s188_s22] sm:$0xff]  ;;  %s373_s26 = sshll.u32 %s372_s12, 3  ;;  %v184_v45 = vsel %vm84_vm5, %v183_v43, %v178_v42  ;;  %s196_s27 = scalar_lea.vmem [#allocation4], %s371_s25 }
  0x4f   :  { %v190_v46 = vsel %vm92_vm6, %v189_v44, %v184_v45  ;;  %v197_v47 = vld [vmem:[%s196_s27] sm:$0xff]  ;;  %s201_s28 = scalar_lea.vmem [#allocation4], %s373_s26  ;;  %s375_s29 = sshll.u32 %s573_s13, 3 }
  0x50   :  { %v202_v48 = vld [vmem:[%s201_s28] sm:$0xff]  ;;  %s377_s30 = sshll.u32 %s575_s14, 3  ;;  %192 = vst [vmem:[#allocation7 + $0x10] sm:$0xff] %v190_v46  ;;  %s207_s3 = scalar_lea.vmem [#allocation4], %s375_s29 }
  0x51   :  { %v203_v49 = vsel %vm44_vm0, %v202_v48, %v197_v47  ;;  %v208_v50 = vld [vmem:[%s207_s3] sm:$0xff]  ;;  %s213_s4 = scalar_lea.vmem [#allocation4], %s377_s30  ;;  %s379_s5 = sshll.u32 %s581_s16, 3 }
  0x52   :  { %v214_v51 = vld [vmem:[%s213_s4] sm:$0xff]  ;;  %s381_s6 = sshll.u32 %s583_s0, 3  ;;  %v209_v52 = vsel %vm52_vm1, %v208_v50, %v203_v49  ;;  %s219_s7 = scalar_lea.vmem [#allocation4], %s379_s5 }
  0x53   :  { %v215_v53 = vsel %vm60_vm2, %v214_v51, %v209_v52  ;;  %v220_v54 = vld [vmem:[%s219_s7] sm:$0xff]  ;;  %s225_s8 = scalar_lea.vmem [#allocation4], %s381_s6  ;;  %s383_s1 = sshll.u32 %s585_s17, 3 }
  0x54   :  { %v226_v55 = vld [vmem:[%s225_s8] sm:$0xff]  ;;  %s385_s9 = sshll.u32 %s587_s18, 3  ;;  %v221_v56 = vsel %vm68_vm3, %v220_v54, %v215_v53  ;;  %s231_s12 = scalar_lea.vmem [#allocation4], %s383_s1 }
  0x55   :  { %v227_v57 = vsel %vm76_vm4, %v226_v55, %v221_v56  ;;  %v232_v58 = vld [vmem:[%s231_s12] sm:$0xff]  ;;  %s237_s13 = scalar_lea.vmem [#allocation4], %s385_s9  ;;  %s425_s14 = scalar_lea.vmem %s248_s15, 512 }
  0x56   :  { %v238_v59 = vld [vmem:[%s237_s13] sm:$0xff]  ;;  %v233_v60 = vsel %vm84_vm5, %v232_v58, %v227_v57  ;;  %p426_p13 = scmp.ne.s32.totalorder %s248_s15, %s425_s14  ;;  %p431_p1 = scmp.lt.s32.totalorder %s425_s14, %s425_s14 }
  0x57   :  { %v239_v61 = vsel %vm92_vm6, %v238_v59, %v233_v60 }
  0x58   :  { %241 = vst [vmem:[#allocation7 + $0x18] sm:$0xff] %v239_v61  ;;  %p432_p2 = por %p431_p1, %p430_p0 }
  0x5a   :  { %p433_p3 = pnand %p432_p2, %p426_p13 }
  0x5c   :  { %436 = shalt.err (!%p433_p3)
}
  0x5d   :  { %s437_s16 = scalar_lea.hbm %s633_s2, 512 }
  0x5e   :  { %p438_p4 = scmp.ne.s32.totalorder %s633_s2, %s437_s16  ;;  %p441_p5 = scmp.lt.u32.totalorder %s437_s16, %s633_s2 }
  0x60   :  { %p443_p6 = pnand %p441_p5, %p438_p4 }
  0x62   :  { %446 = shalt.err (!%p443_p6)
}
  0x63   :  { %253 = dma.vmem_to_hbm [thread:$0]  %s248_s15, 512, %s633_s2, [#allocation6], %s455_s23, %s455_s23, %s456_s24  }
  0x64   :  { %451 = dma.done.wait [#allocation6], 512  }
  0x65   :  { %452 = vsyncadd [#allocation6], 4294966784 }
  0x66   :  { %257 = vsyncpa [#allocation5], 1 }
  0x67   :  { %258 = vsyncpa [#allocation6], 1 }

</bundles_post_ra>
